<compile_context>
chip_gen: v7x
topology: tpu7x:2x2x1
jax: 0.10.0
libtpu: 0.0.40
codegen_flags: <defaults>
</compile_context>

<pallas_src>
import math

import jax
import jax.numpy as jnp
from jax.experimental import pallas as pl
from jax.experimental.pallas import tpu as pltpu

LANE = 128


def _round_up(x, m):
    return ((x + m - 1) // m) * m


def lorentz_mlr_kernel(x_ref, w_ref, p_ref, out_ref):
    """One (tile_n, tile_c) tile of the LorentzMLR forward.

    x_ref  : VMEM (tile_n, f_pad)   Lorentz points (time + space), compute dtype
    w_ref  : VMEM (f_pad, tile_c)   fused weight: row 0 = -w_t, rows 1: = cosh_u * z^T
    p_ref  : VMEM (2, tile_c) f32   row 0 = 1/(sqrt(k)*beta), row 1 = sqrt(k)*beta
    out_ref: VMEM (tile_n, tile_c)  logits
    """
    # alpha = -w_t * x_t + cosh(a/sqrt(k)) * <x_s, z>  as a single MXU matmul.
    alpha = jnp.dot(x_ref[...], w_ref[...], preferred_element_type=jnp.float32)

    recip = p_ref[0:1, :]            # 1 / (sqrt(k) * beta)   (> 0)
    scale = p_ref[1:2, :]            # sqrt(k) * beta         (>= 0)

    # |asinh(t)| = log(|t| + sqrt(t^2 + 1)) since asinh is odd and recip > 0.
    t = jnp.abs(alpha) * recip
    mag = scale * jnp.log(t + jnp.sqrt(t * t + 1.0))          # >= 0

    # copysign(mag, alpha) via bit ops: mag is non-negative, so OR-ing alpha's
    # sign bit in is exact.  Avoids the sign()/select VALU chain.
    sign_bit = pltpu.bitcast(alpha, jnp.uint32) & jnp.uint32(0x80000000)
    signed = pltpu.bitcast(pltpu.bitcast(mag, jnp.uint32) | sign_bit, jnp.float32)

    out_ref[...] = signed.astype(out_ref.dtype)


def lorentz_mlr(x, a, z, k, *, tile_n=1024, tile_c=512,
                compute_dtype=jnp.bfloat16, out_dtype=jnp.float32):
    """x: (B, N, F); a: (C,); z: (C, F-1); k: positive curvature (python float).

    Mirrors the PyTorch forward exactly, including its use of x[0]: only the
    first element along axis 0 is used.  Returns logits of shape (N, C).
    compute_dtype is the MXU input dtype (bf16 halves the x / W DMA streams;
    accumulation and all elementwise math remain f32).
    """
    x0 = x[0]
    n, f = x0.shape
    c, fm1 = z.shape
    assert fm1 == f - 1

    kf = jnp.float32(k)
    sqrt_k = jnp.sqrt(kf)
    inv_sqrt_k = 1.0 / sqrt_k

    z = z.astype(jnp.float32)
    a = a.astype(jnp.float32)

    # --- per-class precompute, hoisted off the per-element path --------------
    norm_z = jnp.sqrt(jnp.sum(z * z, axis=-1))          # (C,)  ||z||
    norm_z = jnp.maximum(norm_z, jnp.float32(1e-30))    # avoid 0*inf -> NaN for all-zero rows
    u = inv_sqrt_k * a
    cosh_u = jnp.cosh(u)                                # (C,)
    sinh_u = jnp.sinh(u)                                # (C,)
    w_t = sinh_u * norm_z                               # (C,)
    # beta = sqrt(cosh^2*||z||^2 - w_t^2) == ||z|| exactly (cosh^2 - sinh^2 = 1).
    beta = norm_z
    recip = inv_sqrt_k / beta                           # (C,)  1/(sqrt(k)*beta)
    scale = sqrt_k * beta                               # (C,)  sqrt(k)*beta

    # Fused weight so alpha = x0 @ W on the MXU (time term folded into row 0).
    w = jnp.concatenate([-w_t[None, :], cosh_u[None, :] * z.T], axis=0)   # (F, C)

    # --- layout: classes -> lanes (pad to 128), F -> 16-row granule ----------
    f_pad = _round_up(f, 16)
    c_pad = _round_up(c, LANE)

    tile_c = _round_up(min(tile_c, c_pad), LANE)
    tile_n = _round_up(min(tile_n, _round_up(n, 16)), 16)

    cbytes = jnp.dtype(compute_dtype).itemsize
    obytes = jnp.dtype(out_dtype).itemsize

    def _vmem_bytes(tn, tc):
        # double-buffered x, W, params (padded to 8 sublanes) and out tiles
        return 2 * (tn * f_pad * cbytes + f_pad * tc * cbytes
                    + 8 * tc * 4 + tn * tc * obytes)

    # Keep the working set inside the default scoped-VMEM budget on every chip
    # generation (v5e default = 16 MiB) rather than overriding vmem_limit_bytes.
    budget = 10 << 20
    while _vmem_bytes(tile_n, tile_c) > budget and tile_c > LANE:
        tile_c = max(LANE, (tile_c // 2) // LANE * LANE)
    while _vmem_bytes(tile_n, tile_c) > budget and tile_n > 16:
        tile_n = max(16, (tile_n // 2) // 16 * 16)

    # --- operands (only the class dim is materially padded) ------------------
    xc = x0.astype(compute_dtype)
    if f_pad != f:
        xc = jnp.pad(xc, ((0, 0), (0, f_pad - f)))
    w_p = jnp.zeros((f_pad, c_pad), compute_dtype).at[:f, :c].set(w.astype(compute_dtype))
    params = jnp.zeros((2, c_pad), jnp.float32)
    params = params.at[0, :c].set(recip).at[1, :c].set(scale)

    grid_n = pl.cdiv(n, tile_n)        # ragged tail row-tile is masked by Pallas
    grid_c = pl.cdiv(c_pad, tile_c)

    cost = pl.CostEstimate(
        flops=2 * n * f_pad * c_pad,
        transcendentals=2 * n * c_pad,                       # log + sqrt per logit
        bytes_accessed=(n * f_pad * cbytes + f_pad * c_pad * cbytes
                        + 2 * c_pad * 4 + n * c_pad * obytes),
    )

    out = pl.pallas_call(
        lorentz_mlr_kernel,
        out_shape=jax.ShapeDtypeStruct((n, c_pad), out_dtype),
        grid_spec=pltpu.PrefetchScalarGridSpec(
            num_scalar_prefetch=0,
            grid=(grid_n, grid_c),
            in_specs=[
                pl.BlockSpec((tile_n, f_pad), lambda i, j: (i, 0)),   # x row tile
                pl.BlockSpec((f_pad, tile_c), lambda i, j: (0, j)),   # fused W col tile
                pl.BlockSpec((2, tile_c), lambda i, j: (0, j)),       # recip/scale
            ],
            out_specs=pl.BlockSpec((tile_n, tile_c), lambda i, j: (i, j)),
        ),
        compiler_params=pltpu.CompilerParams(
            dimension_semantics=("parallel", "parallel"),
        ),
        cost_estimate=cost,
    )(xc, w_p, params)

    return out if c_pad == c else out[:, :c]


def lorentz_mlr_reference(x, a, z, k):
    """Pure-JAX reference mirroring the PyTorch forward line by line."""
    x0 = x[0]
    sqrt_mk = 1.0 / jnp.sqrt(k)
    norm_z = jnp.linalg.norm(z, axis=-1)                             # (C,)
    w_t = jnp.sinh(sqrt_mk * a) * norm_z                             # (C,)
    w_s = jnp.cosh(sqrt_mk * a)[:, None] * z                         # (C, F-1)
    beta = jnp.sqrt(-w_t ** 2 + jnp.linalg.norm(w_s, axis=-1) ** 2)  # (C,)
    alpha = (-w_t * x0[..., 0:1]
             + jnp.cosh(sqrt_mk * a) * (x0[..., 1:] @ z.T))          # (N, C)
    d = jnp.sqrt(k) * jnp.abs(jnp.arcsinh(sqrt_mk * alpha / beta))
    return jnp.sign(alpha) * beta * d


if __name__ == "__main__":
    # Small module configuration consistent with the PyTorch __init__.
    num_features = 32
    num_classes = 10
    batch, seq = 2, 8
    k = 1.0                                   # manifold curvature

    key = jax.random.PRNGKey(0)
    kz, ka, kx = jax.random.split(key, 3)

    # Deterministic parameter init matching init_weights():
    # stdv = 1 / sqrt(z.size(1)) = 1 / sqrt(num_features - 1)
    stdv = 1.0 / math.sqrt(num_features - 1)
    z = jax.random.uniform(kz, (num_classes, num_features - 1),
                           minval=-stdv, maxval=stdv, dtype=jnp.float32)
    a = jax.random.uniform(ka, (num_classes,),
                           minval=-stdv, maxval=stdv, dtype=jnp.float32)

    # Input points on the Lorentz hyperboloid: x_t = sqrt(1/k + ||x_s||^2)
    x_space = 0.5 * jax.random.normal(kx, (batch, seq, num_features - 1),
                                      dtype=jnp.float32)
    x_time = jnp.sqrt(1.0 / k + jnp.sum(x_space ** 2, axis=-1, keepdims=True))
    x = jnp.concatenate([x_time, x_space], axis=-1)    # (B, N, F)

    ref = lorentz_mlr_reference(x, a, z, k)

    # Exact-semantics path (f32 MXU inputs) -- tight tolerance.
    logits_f32 = jax.block_until_ready(
        lorentz_mlr(x, a, z, k, compute_dtype=jnp.float32))
    assert logits_f32.shape == (seq, num_classes)
    assert jnp.allclose(logits_f32, ref, rtol=1e-4, atol=1e-4), (
        f"f32 path max abs err {jnp.max(jnp.abs(logits_f32 - ref))}")

    # Fast path (bf16 MXU inputs, f32 accumulation) -- tolerance reflects bf16
    # input quantization, not accumulation error.
    logits_bf16 = jax.block_until_ready(lorentz_mlr(x, a, z, k))
    assert logits_bf16.shape == (seq, num_classes)
    assert jnp.allclose(logits_bf16, ref, rtol=3e-2, atol=3e-2), (
        f"bf16 path max abs err {jnp.max(jnp.abs(logits_bf16 - ref))}")

    print("KERNEL_OK")
</pallas_src>

<mosaic_0001>
module attributes {stable_mosaic.version = 11 : i64} {
  func.func @lorentz_mlr_kernel(%arg0: i32, %arg1: i32, %arg2: memref<16x32xf32, #tpu.memory_space<vmem>>, %arg3: memref<32x128xf32, #tpu.memory_space<vmem>>, %arg4: memref<2x128xf32, #tpu.memory_space<vmem>>, %arg5: memref<16x128xf32, #tpu.memory_space<vmem>>) attributes {dimension_semantics = [#tpu.dimension_semantics<parallel>, #tpu.dimension_semantics<parallel>], iteration_bounds = array<i64: 1, 1>, scalar_prefetch = 0 : i64, scratch_operands = 0 : i64, tpu.core_type = #tpu.core_type<tc>, window_params = [{transform_indices = @transform_0, window_bounds = array<i64: 16, 32>}, {transform_indices = @transform_1, window_bounds = array<i64: 32, 128>}, {transform_indices = @transform_2, window_bounds = array<i64: 2, 128>}, {transform_indices = @transform_3, window_bounds = array<i64: 16, 128>}]} {
    %c0 = arith.constant 0 : index
    %c0_0 = arith.constant 0 : index
    %0 = vector.load %arg2[%c0, %c0_0] : memref<16x32xf32, #tpu.memory_space<vmem>>, vector<16x32xf32>
    %c0_1 = arith.constant 0 : index
    %c0_2 = arith.constant 0 : index
    %1 = vector.load %arg3[%c0_1, %c0_2] : memref<32x128xf32, #tpu.memory_space<vmem>>, vector<32x128xf32>
    %cst = arith.constant dense<0.000000e+00> : vector<16x128xf32>
    %2 = tpu.matmul %0, %1, %cst {dimension_numbers = #tpu.dot_dimension_numbers<[1], [0], [0], [1], [0, 0, 1, 1], [], []>} : vector<16x32xf32>, vector<32x128xf32>, vector<16x128xf32> -> vector<16x128xf32>
    %c0_3 = arith.constant 0 : index
    %c0_4 = arith.constant 0 : index
    %3 = vector.load %arg4[%c0_3, %c0_4] : memref<2x128xf32, #tpu.memory_space<vmem>>, vector<1x128xf32>
    %c1 = arith.constant 1 : index
    %c0_5 = arith.constant 0 : index
    %4 = vector.load %arg4[%c1, %c0_5] : memref<2x128xf32, #tpu.memory_space<vmem>>, vector<1x128xf32>
    %5 = math.absf %2 : vector<16x128xf32>
    %6 = vector.broadcast %3 : vector<1x128xf32> to vector<16x128xf32>
    %7 = arith.mulf %5, %6 : vector<16x128xf32>
    %8 = arith.mulf %7, %7 : vector<16x128xf32>
    %cst_6 = arith.constant 1.000000e+00 : f32
    %9 = vector.broadcast %cst_6 : f32 to vector<16x128xf32>
    %10 = arith.addf %8, %9 : vector<16x128xf32>
    %11 = math.sqrt %10 : vector<16x128xf32>
    %12 = arith.addf %7, %11 : vector<16x128xf32>
    %13 = math.log %12 : vector<16x128xf32>
    %14 = vector.broadcast %4 : vector<1x128xf32> to vector<16x128xf32>
    %15 = arith.mulf %14, %13 : vector<16x128xf32>
    %16 = tpu.bitcast %2 : vector<16x128xf32> -> vector<16x128xi32>
    %c-2147483648_i32 = arith.constant -2147483648 : i32
    %17 = vector.broadcast %c-2147483648_i32 : i32 to vector<16x128xi32>
    %18 = arith.andi %16, %17 : vector<16x128xi32>
    %19 = tpu.bitcast %15 : vector<16x128xf32> -> vector<16x128xi32>
    %20 = arith.ori %19, %18 : vector<16x128xi32>
    %21 = tpu.bitcast %20 : vector<16x128xi32> -> vector<16x128xf32>
    %c0_7 = arith.constant 0 : index
    %c0_8 = arith.constant 0 : index
    %22 = vector.load %arg5[%c0_7, %c0_8] : memref<16x128xf32, #tpu.memory_space<vmem>>, vector<16x128xf32>
    tpu.vector_store %arg5[%c0_7, %c0_8], %21 {strides = array<i32>} : memref<16x128xf32, #tpu.memory_space<vmem>>, vector<16x128xf32>,
    return
  }
  func.func @transform_0(%arg0: i32, %arg1: i32) -> (i32, i32) {
    %c0_i32 = arith.constant 0 : i32
    %c0_i32_0 = arith.constant 0 : i32
    return %arg0, %c0_i32 : i32, i32
  }
  func.func @transform_1(%arg0: i32, %arg1: i32) -> (i32, i32) {
    %c0_i32 = arith.constant 0 : i32
    %c0_i32_0 = arith.constant 0 : i32
    return %c0_i32, %arg1 : i32, i32
  }
  func.func @transform_2(%arg0: i32, %arg1: i32) -> (i32, i32) {
    %c0_i32 = arith.constant 0 : i32
    %c0_i32_0 = arith.constant 0 : i32
    return %c0_i32, %arg1 : i32, i32
  }
  func.func @transform_3(%arg0: i32, %arg1: i32) -> (i32, i32) {
    %c0_i32 = arith.constant 0 : i32
    return %arg0, %arg1 : i32, i32
  }
}

</mosaic_0001>

<bundles_post_ra>
// kernel: tpu_custom_call.1
= control target key start
LH: loop header
LB: loop body
LE: loop exit
PB: predicated region body
PF: predicated region fallthrough
CT: control target
= control target key end

     0   :  { %8 = vsyncpa [#allocation3], 0  ;;  %s391_s0 = inlined_call_operand.hbm [shape: f32[8,32], index: 0, kind: input, shape index: {}]   ;;  %s392_s1 = inlined_call_operand.hbm [shape: f32[32,128], index: 1, kind: input, shape index: {}]   ;;  %s393_s2 = inlined_call_operand.vmem [shape: f32[2,128], index: 2, kind: input, shape index: {}]   ;;  %s394_s3 = inlined_call_operand.hbm [shape: f32[8,128], index: 3, kind: output, shape index: {}]  }
   0x1   :  { %9 = vsyncpa [#allocation6], 0 }
   0x2   :  { %10 = vsyncpa [#allocation4], 0 }
   0x3   :  { %15 = vsyncadd [#allocation3], 128  ;;  %s315_s12 = smov [#allocation2]   ;;  %s243_s16 = scalar_lea.hbm %s391_s0, 128 }
   0x4   :  { %s16_s13 = sshll.u32 %s315_s12, 4  ;;  %p244_p0 = scmp.ne.s32.totalorder %s391_s0, %s243_s16  ;;  %s17_s13 = int_to_ptr.vmem [resolvable:$true] %s16_s13 }
   0x5   :  { %p247_p1 = scmp.lt.u32.totalorder %s243_s16, %s391_s0 }
   0x7   :  { %p249_p2 = pnand %p247_p1, %p244_p0 }
   0x9   :  { %252 = shalt.err (!%p249_p2)
}
   0xa   :  { %s253_s21 = scalar_lea.vmem %s17_s13, 128  ;;  %s257_s22 = scalar_lea.vmem %s17_s13, 256 }
   0xb   :  { %p254_p3 = scmp.ne.s32.totalorder %s17_s13, %s253_s21  ;;  %p258_p4 = scmp.lt.s32.totalorder %s17_s13, %s17_s13 }
   0xc   :  { %p259_p5 = scmp.lt.s32.totalorder %s257_s22, %s253_s21 }
   0xe   :  { %p260_p6 = por %p259_p5, %p258_p4 }
  0x10   :  { %p261_p7 = pnand %p260_p6, %p254_p3 }
  0x12   :  { %264 = shalt.err (!%p261_p7)
}
  0x13   :  { %s316_s23 = smov 128   ;;  %s317_s24 = smov 8  }
  0x14   :  { %22 = dma.hbm_to_vmem [thread:$0]  %s391_s0, 128, %s17_s13, [#allocation3], %s316_s23, %s316_s23, %s317_s24  }
  0x15   :  { %s318_s27 = smov [#allocation5]   ;;  %s265_s4 = scalar_lea.hbm %s392_s1, 512 }
  0x16   :  { %s28_s28 = sshll.u32 %s318_s27, 4  ;;  %p266_p8 = scmp.ne.s32.totalorder %s392_s1, %s265_s4  ;;  %s29_s28 = int_to_ptr.vmem [resolvable:$true] %s28_s28 }
  0x17   :  { %p269_p9 = scmp.lt.u32.totalorder %s265_s4, %s392_s1 }
  0x19   :  { %p271_p10 = pnand %p269_p9, %p266_p8 }
  0x1b   :  { %274 = shalt.err (!%p271_p10)
}
  0x1c   :  { %s275_s9 = scalar_lea.vmem %s29_s28, 512  ;;  %p280_p12 = scmp.lt.s32.totalorder %s29_s28, %s29_s28 }
  0x1d   :  { %p276_p11 = scmp.ne.s32.totalorder %s29_s28, %s275_s9  ;;  %p281_p13 = scmp.lt.s32.totalorder %s275_s9, %s275_s9 }
  0x1f   :  { %p282_p0 = por %p281_p13, %p280_p12 }
  0x21   :  { %p283_p1 = pnand %p282_p0, %p276_p11 }
  0x23   :  { %286 = shalt.err (!%p283_p1)
}
  0x24   :  { %34 = dma.hbm_to_vmem [thread:$0]  %s392_s1, 512, %s29_s28, [#allocation6], %s316_s23, %s316_s23, %s317_s24  }
  0x25   :  { %309 = dma.done.wait [#allocation3], 256  }
  0x26   :  { %310 = vsyncadd [#allocation3], 4294967040 }
  0x27   :  { %311 = dma.done.wait [#allocation6], 512  }
  0x28   :  { %312 = vsyncadd [#allocation6], 4294966784  ;;  %vm49_vm0 = vcmask 261120   ;;  %v45_v0 = vld [vmem:[#allocation5] sm:$0xff]  ;;  %v46_v1 = vld [vmem:[#allocation5 + $0x8] sm:$0xff] }
  0x29   :  { %v47_v2 = vld [vmem:[#allocation5 + $0x10] sm:$0xff]  ;;  %v222_v3 = vpack.c.bf16 %v46_v1, %v45_v0  ;;  %v48_v4 = vld [vmem:[#allocation5 + $0x18] sm:$0xff] }
  0x2a   :  { %v43_v5 = vld [vmem:[#allocation2] sm:$0xff]  ;;  %v226_v6 = vpack.c.bf16 %v48_v4, %v47_v2  ;;  %v44_v7 = vld [vmem:[#allocation2 + $0x8] sm:$0xff] }
  0x2b   :  { %219 = vmatprep.mubr.msk.f32.mxu0 %vm49_vm0, %v43_v5  ;;  %223 = vmatprep.subr.bf16.mxu0 %v222_v3  ;;  %v203_v9 = vld [vmem:[%s393_s2] ss:$0 sm:$0xff]  ;;  %v204_v32 = vld [vmem:[%s393_s2 + $0x1] ss:$0 sm:$0xff] }
  0x2c   :  { %225 = vmatpush3.bf16.msra.mxu0 %v222_v3 }
  0x2d   :  { %227 = vmatprep.subr.bf16.mxu0 %v226_v6 }
  0x30   :  { %229 = vmatpush3.bf16.msra.mxu0 %v226_v6 }
  0x33   :  { %220 = vmatmul.mubr.msk.f32.vlgmr.msra.gmra.mrb[0].mxu0 %vm49_vm0, %v44_v7 }
 0x106   :  { %v221_v8 = vpop.f32.mrb[0].mxu0 }
 0x107   :  { %v134_v10 = vand.u32 2147483647, %v221_v8  ;;  %v122_v11 = vpop.f32.mrb[1].mxu0  ;;  %v174_v36 = vand.u32 2147483648, %v221_v8 }
 0x108   :  { %v133_v12 = vand.u32 2147483647, %v122_v11  ;;  %v173_v39 = vand.u32 2147483648, %v122_v11 }
 0x109   :  { %v140_v13 = vmul.f32 %v203_v9, %v134_v10 }
 0x10a   :  { %v139_v14 = vmul.f32 %v203_v9, %v133_v12 }
 0x10b   :  { %v142_v15 = vmul.f32 %v140_v13, %v140_v13 }
 0x10c   :  { %v141_v16 = vmul.f32 %v139_v14, %v139_v14 }
 0x10d   :  { %v144_v17 = vadd.f32 1.0, %v142_v15 }
 0x10e   :  { %v143_v18 = vadd.f32 1.0, %v141_v16 }
 0x10f   :  { %235 = vrsqrt.f32 %v144_v17  ;;  %vm154_vm1 = vcmp.eq.f32.partialorder %v144_v17, inf  ;;  %v157_v23 = vand.u32 2147483648, %v144_v17  ;;  %vm156_vm3 = vcmp.eq.f32.partialorder %v144_v17, 0.0 }
 0x110   :  { %237 = vrsqrt.f32 %v143_v18  ;;  %vm147_vm2 = vcmp.eq.f32.partialorder %v143_v18, inf  ;;  %v150_v24 = vand.u32 2147483648, %v143_v18  ;;  %vm149_vm4 = vcmp.eq.f32.partialorder %v143_v18, 0.0 }
 0x119   :  { %v236_v19 = vpop.eup %235 }
 0x11a   :  { %v238_v20 = vpop.eup %237  ;;  %v153_v21 = vmul.f32 %v236_v19, %v144_v17 }
 0x11b   :  { %v146_v22 = vmul.f32 %v238_v20, %v143_v18 }
 0x11c   :  { %v155_v25 = vsel %vm154_vm1, %v144_v17, %v153_v21 }
 0x11d   :  { %v148_v26 = vsel %vm147_vm2, %v143_v18, %v146_v22  ;;  %v158_v27 = vsel %vm156_vm3, %v157_v23, %v155_v25 }
 0x11e   :  { %v151_v28 = vsel %vm149_vm4, %v150_v24, %v148_v26  ;;  %v160_v29 = vadd.f32 %v158_v27, %v140_v13 }
 0x11f   :  { %v159_v30 = vadd.f32 %v151_v28, %v139_v14 }
 0x120   :  { %239 = vlog2.f32 %v160_v29 }
 0x121   :  { %241 = vlog2.f32 %v159_v30 }
 0x12a   :  { %v240_v31 = vpop.eup %239 }
 0x12b   :  { %v242_v33 = vpop.eup %241  ;;  %v164_v34 = vmul.f32 0.6931472, %v240_v31 }
 0x12c   :  { %v162_v35 = vmul.f32 0.6931472, %v242_v33 }
 0x12d   :  { %v170_v37 = vmul.f32 %v204_v32, %v164_v34 }
 0x12e   :  { %v169_v38 = vmul.f32 %v204_v32, %v162_v35 }
 0x12f   :  { %v178_v40 = vor.u32 %v174_v36, %v170_v37 }
 0x130   :  { %v177_v41 = vor.u32 %v173_v39, %v169_v38 }
 0x131   :  { %182 = vst [vmem:[#allocation7 + $0x8] sm:$0xff] %v178_v40 }
 0x132   :  { %181 = vst [vmem:[#allocation7] sm:$0xff] %v177_v41 }
 0x133   :  { %187 = vsyncadd [#allocation4], 128  ;;  %s319_s14 = smov [#allocation7]  }
 0x134   :  { %s188_s15 = sshll.u32 %s319_s14, 4  ;;  %s189_s15 = int_to_ptr.vmem [resolvable:$true] %s188_s15 }
 0x135   :  { %s287_s16 = scalar_lea.vmem %s189_s15, 128  ;;  %s291_s17 = scalar_lea.vmem %s189_s15, 256 }
 0x136   :  { %p288_p2 = scmp.ne.s32.totalorder %s189_s15, %s287_s16  ;;  %p292_p3 = scmp.lt.s32.totalorder %s189_s15, %s189_s15 }
 0x137   :  { %p293_p4 = scmp.lt.s32.totalorder %s291_s17, %s287_s16 }
 0x139   :  { %p294_p5 = por %p293_p4, %p292_p3 }
 0x13b   :  { %p295_p6 = pnand %p294_p5, %p288_p2 }
 0x13d   :  { %298 = shalt.err (!%p295_p6)
}
 0x13e   :  { %s299_s19 = scalar_lea.hbm %s394_s3, 128 }
 0x13f   :  { %p300_p7 = scmp.ne.s32.totalorder %s394_s3, %s299_s19  ;;  %p303_p8 = scmp.lt.u32.totalorder %s299_s19, %s394_s3 }
 0x141   :  { %p305_p9 = pnand %p303_p8, %p300_p7 }
 0x143   :  { %308 = shalt.err (!%p305_p9)
}
 0x144   :  { %194 = dma.vmem_to_hbm [thread:$0]  %s189_s15, 128, %s394_s3, [#allocation4], %s316_s23, %s316_s23, %s317_s24  }
 0x145   :  { %313 = dma.done.wait [#allocation4], 256  }
 0x146   :  { %314 = vsyncadd [#allocation4], 4294967040 }
 0x147   :  { %198 = vsyncpa [#allocation3], 1 }
 0x148   :  { %199 = vsyncpa [#allocation6], 1 }
 0x149   :  { %200 = vsyncpa [#allocation4], 1 }

</bundles_post_ra>
